<compile_context>
chip_gen: v7x
topology: tpu7x:2x2x1
jax: 0.10.0
libtpu: 0.0.40
codegen_flags: <defaults>
</compile_context>

<pallas_src>
import functools

import numpy as np

import jax
import jax.numpy as jnp
from jax.experimental import pallas as pl
from jax.experimental.pallas import tpu as pltpu


# ----------------------------------------------------------------------------
# Model constants (shapes implied by a tiny YOLOv5 head)
# ----------------------------------------------------------------------------
NUM_CHANNELS = 3       # cfg.MODEL.NUM_CHANNELS
NUM_CLASSES = 4        # cfg.MODEL.NUM_CLASSES
C1, C2 = 8, 16         # hidden widths
NA = 3                 # anchors per scale
NO = NUM_CLASSES + 5   # 9 outputs per anchor
NP = 128               # lane-padded head width (NA*NO = 27 -> 128 lanes)
K1 = 9 * NUM_CHANNELS  # 27  (3x3 stem patch length)
K2 = 9 * C1            # 72  (3x3 conv2 patch length)
G1 = 16                # stem row-group: G1*C1 = 128 -> dense 128-lane stores

# Anchor grid for this single detection layer, in *input-pixel* units
# (i.e. YOLOv5's anchors * stride), so no further stride multiply in decode.
ANCHOR_GRID = np.array([[10.0, 13.0], [16.0, 30.0], [33.0, 23.0]], np.float32)

# Per-step buffers are tiny (<2.5 MB double-buffered even at tm=4096); 40 MB
# leaves headroom under v7x's 64 MiB physical VMEM, v5e/v6e have 128 MiB.
VMEM_LIMIT_BYTES = 40 * 1024 * 1024


# ----------------------------------------------------------------------------
# Pallas kernels
# ----------------------------------------------------------------------------
def _conv_silu_kernel(p_ref, w_ref, b_ref, o_ref):
    """Group-packed patches @ block-diag(W) + b -> SiLU.

    Each input row holds G1 spatial positions' patches back-to-back, the
    weight is block-diagonal (G1 copies of [K1, C1]), so each output row is a
    dense 128-lane slab = G1 positions x C1 channels (unmasked stores)."""
    acc = jnp.dot(p_ref[...], w_ref[...], preferred_element_type=jnp.float32)
    acc = acc + b_ref[...]                       # BN folded into bias
    acc = acc * jax.nn.sigmoid(acc)              # SiLU (EUP sigmoid + VPU mul)
    o_ref[...] = acc.astype(o_ref.dtype)


def _conv_head_decode_kernel(p_ref, w2_ref, b2_ref, w3_ref, b3_ref, dec_ref,
                             *out_refs, tm, nx, ny, stride,
                             want_head, want_pred):
    """conv2 (3x3/s2 as matmul) + SiLU, Detect 1x1 head, and YOLOv5 decode,
    fused for one row tile.  The [tm, C2] intermediate never hits HBM.
    Outputs (static): [head logits if want_head] + [decoded pred if want_pred]."""
    # --- conv2 + bias + SiLU ---
    x = jnp.dot(p_ref[...], w2_ref[...], preferred_element_type=jnp.float32)
    x = x + b2_ref[...]
    x = x * jax.nn.sigmoid(x)

    # --- detect head: 1x1 conv, lane-padded to 128 output channels ---
    h = jnp.dot(x.astype(w3_ref.dtype), w3_ref[...],
                preferred_element_type=jnp.float32)
    h = h + b3_ref[...]

    idx = 0
    if want_head:                                # raw logits (training output)
        out_refs[idx][...] = h.astype(out_refs[idx].dtype)
        idx += 1

    if want_pred:
        # --- Detect decode: y=sigmoid(h); xy=(2y-0.5+grid)*stride; wh=(2y)^2*anchor
        dec = dec_ref[...]                       # [8, NP] constant table
        is_xy = dec[0:1, :] > 0.5
        is_wh = dec[1:2, :] > 0.5
        anch = dec[2:3, :]                       # anchor_grid value at wh lanes
        sel_x = dec[3:4, :]                      # 1.0 at x-slot lanes
        sel_y = dec[4:5, :]                      # 1.0 at y-slot lanes

        y = jax.nn.sigmoid(h)

        # Recover (gx, gy) from the global spatial row index
        # (row = b*ny*nx + gy*nx + gx).  Kept at shape (tm, 1) — the only wide
        # tensor is the final broadcast into the lane table.  Row indices are
        # < 2^23 so the f32 math is exact; the +0.5 guard before floor makes
        # the quotient exact at cell boundaries even if the divide/reciprocal
        # is off by a few ulp (equivalent to exact int32 // and %).
        r = pl.program_id(0) * tm + jax.lax.broadcasted_iota(
            jnp.int32, (tm, 1), 0)
        rf = r.astype(jnp.float32)
        q = jnp.floor((rf + 0.5) * (1.0 / float(nx)))        # = b*ny + gy
        gx = rf - q * float(nx)
        gy = q - jnp.floor((q + 0.5) * (1.0 / float(ny))) * float(ny)
        grid_lane = gx * sel_x + gy * sel_y                   # (tm, NP)

        xy = (y * 2.0 - 0.5 + grid_lane) * stride
        wh = (y * 2.0) * (y * 2.0) * anch
        pred = jnp.where(is_xy, xy, jnp.where(is_wh, wh, y))
        out_refs[idx][...] = pred.astype(out_refs[idx].dtype)


# ----------------------------------------------------------------------------
# pallas_call wrappers (row tiling, padding, compiler params)
# ----------------------------------------------------------------------------
def _round_up(x, m):
    return ((x + m - 1) // m) * m


def _tile_rows(m, base, unit):
    """Row-tile size (multiple of `unit`) and padded row count.  If the step
    count would be odd, halve the tile so v7x's two TensorCores both get work
    (near-zero effect on single-TC v5e/v6e)."""
    tm = min(_round_up(base, unit), _round_up(max(m, 1), unit))
    m_pad = _round_up(m, tm)
    if (m_pad // tm) % 2 == 1 and tm >= 2 * unit:
        tm = _round_up(tm // 2, unit)
        m_pad = _round_up(m, tm)
    return tm, m_pad


def _pad_rows(x, m_pad):
    m = x.shape[0]
    return x if m_pad == m else jnp.pad(x, ((0, m_pad - m), (0, 0)))


def stem_conv_silu(patches, w_block, b_wide, *, tm_base=4096):
    """Stem Conv3x3/s2 + BN + SiLU as a group-packed, lane-dense matmul kernel.

    patches: [M, K1] bf16.  Rows are packed G1 at a time -> [M/G1, G1*K1] and
    multiplied by the (G1*K1, G1*C1)=(432,128) block-diagonal weight, giving a
    dense 128-lane output slab per row (no masked vst) and 16x fewer MXU rows."""
    M, K = patches.shape
    assert K == K1
    tm, m_pad = _tile_rows(M, tm_base, G1 * 8)      # tm multiple of 128
    tg = tm // G1
    pg = _pad_rows(patches, m_pad).reshape(m_pad // G1, G1 * K1)
    out = pl.pallas_call(
        _conv_silu_kernel,
        out_shape=jax.ShapeDtypeStruct((m_pad // G1, G1 * C1), jnp.bfloat16),
        grid=(m_pad // tm,),
        in_specs=[
            pl.BlockSpec((tg, G1 * K1), lambda i: (i, 0)),      # packed patches
            pl.BlockSpec((G1 * K1, G1 * C1), lambda i: (0, 0)),  # block-diag W
            pl.BlockSpec((1, G1 * C1), lambda i: (0, 0)),        # tiled bias
        ],
        out_specs=pl.BlockSpec((tg, G1 * C1), lambda i: (i, 0)),
        compiler_params=pltpu.CompilerParams(
            dimension_semantics=("parallel",),
            vmem_limit_bytes=VMEM_LIMIT_BYTES),
    )(pg, w_block, b_wide)
    # Row-major unpack back to [M, C1] (layout-compatible reshape, no copy cost
    # beyond a trivial XLA reshape).
    return out.reshape(m_pad, C1)[:M]


def conv_head_decode(patches, pp, *, ny, nx, stride, want_pred=True,
                     want_head=False, pred_dtype=jnp.float32, tm_base=2048):
    """Fused conv2 + detect head (+ optional box decode).

    Inference: want_pred=True, want_head=False -> only decoded boxes stored.
    Training:  want_head=True, want_pred=False -> only raw logits stored.
    pred_dtype=jnp.bfloat16 halves store traffic (useful on v5e) at ~2px xy
    resolution loss for 640px inputs — f32 by default."""
    assert want_pred or want_head
    M, K = patches.shape
    assert K == K2
    tm, m_pad = _tile_rows(M, tm_base, 8)
    kernel = functools.partial(
        _conv_head_decode_kernel, tm=tm, nx=nx, ny=ny, stride=stride,
        want_head=want_head, want_pred=want_pred)

    out_shapes, out_specs = [], []
    if want_head:
        out_shapes.append(jax.ShapeDtypeStruct((m_pad, NP), jnp.float32))
        out_specs.append(pl.BlockSpec((tm, NP), lambda i: (i, 0)))
    if want_pred:
        out_shapes.append(jax.ShapeDtypeStruct((m_pad, NP), pred_dtype))
        out_specs.append(pl.BlockSpec((tm, NP), lambda i: (i, 0)))

    outs = pl.pallas_call(
        kernel,
        out_shape=tuple(out_shapes),
        grid=(m_pad // tm,),
        in_specs=[
            pl.BlockSpec((tm, K2), lambda i: (i, 0)),    # conv2 patches (tiled)
            pl.BlockSpec((K2, C2), lambda i: (0, 0)),    # w2 (resident)
            pl.BlockSpec((1, C2), lambda i: (0, 0)),     # b2
            pl.BlockSpec((C2, NP), lambda i: (0, 0)),    # w3 (lane-padded)
            pl.BlockSpec((1, NP), lambda i: (0, 0)),     # b3
            pl.BlockSpec((8, NP), lambda i: (0, 0)),     # decode constant table
        ],
        out_specs=tuple(out_specs),
        compiler_params=pltpu.CompilerParams(
            dimension_semantics=("parallel",),
            vmem_limit_bytes=VMEM_LIMIT_BYTES),
    )(_pad_rows(patches, m_pad), pp["w2"], pp["b2"], pp["w3"], pp["b3"],
      pp["dec"])

    outs = list(outs) if isinstance(outs, (list, tuple)) else [outs]
    outs = [o[:M] for o in outs]
    head = outs[0] if want_head else None
    pred = outs[-1] if want_pred else None
    return head, pred


# ----------------------------------------------------------------------------
# Glue: im2col (pure reshaping/slicing — stays in JAX)
# ----------------------------------------------------------------------------
def im2col(x_nhwc, k, s, p):
    B, H, W, C = x_nhwc.shape
    xp = jnp.pad(x_nhwc, ((0, 0), (p, p), (p, p), (0, 0)))
    Hout = (H + 2 * p - k) // s + 1
    Wout = (W + 2 * p - k) // s + 1
    cols = []
    for i in range(k):
        for j in range(k):
            cols.append(xp[:, i:i + Hout * s:s, j:j + Wout * s:s, :])
    P = jnp.concatenate(cols, axis=-1)           # [B, Hout, Wout, k*k*C]
    return P.reshape(B * Hout * Wout, k * k * C), Hout, Wout


# ----------------------------------------------------------------------------
# Parameters
# ----------------------------------------------------------------------------
def init_params(key):
    k1, k2, k3, k4, k5, k6 = jax.random.split(key, 6)
    return {
        # stem conv 3x3/s2 (Conv+BN fused into weight/bias)
        "w1": 0.1 * jax.random.normal(k1, (K1, C1), jnp.float32),
        "b1": 0.1 * jax.random.normal(k2, (1, C1), jnp.float32),
        # conv 3x3/s2
        "w2": 0.1 * jax.random.normal(k3, (K2, C2), jnp.float32),
        "b2": 0.1 * jax.random.normal(k4, (1, C2), jnp.float32),
        # detect head 1x1 conv -> na * (nc + 5)
        "w3": 0.1 * jax.random.normal(k5, (C2, NA * NO), jnp.float32),
        "b3": 0.1 * jax.random.normal(k6, (1, NA * NO), jnp.float32),
    }


def _decode_table():
    """[8, NP] constant table for the in-kernel Detect decode.
    rows: 0=is_xy mask, 1=is_wh mask, 2=anchor_grid value, 3=sel_gx, 4=sel_gy."""
    t = np.zeros((8, NP), np.float32)
    for a in range(NA):
        for s in range(NO):
            c = a * NO + s
            if s < 2:
                t[0, c] = 1.0
                t[3 + s, c] = 1.0
            elif s < 4:
                t[1, c] = 1.0
                t[2, c] = ANCHOR_GRID[a, s - 2]
    return jnp.asarray(t)


def prepare_params(params):
    """Fold /255 into the stem weights, build the group-packed block-diagonal
    stem weight, cast MXU operands to bf16, lane-pad the detect head to 128
    outputs, and build the decode constant table."""
    w1 = params["w1"] * (1.0 / 255.0)                         # /255 folded
    w1_block = jnp.kron(jnp.eye(G1, dtype=w1.dtype), w1)      # (432, 128)
    b1_wide = jnp.tile(params["b1"], (1, G1))                 # (1, 128)
    w3 = jnp.zeros((C2, NP), jnp.float32).at[:, : NA * NO].set(params["w3"])
    b3 = jnp.zeros((1, NP), jnp.float32).at[:, : NA * NO].set(params["b3"])
    return {
        "w1b": w1_block.astype(jnp.bfloat16),
        "b1w": b1_wide.astype(jnp.float32),
        "w2": params["w2"].astype(jnp.bfloat16),
        "b2": params["b2"].astype(jnp.float32),
        "w3": w3.astype(jnp.bfloat16),
        "b3": b3,
        "dec": _decode_table(),
    }


# ----------------------------------------------------------------------------
# Forward pass
# ----------------------------------------------------------------------------
def yolov5_forward(images_nchw, pp, *, training=False):
    """images_nchw: float32 [B, C, H, W] raw 0..255 pixels (the equivalent of
    torch.stack([i['image'] ...])); the /255 normalization is folded into the
    stem weights.  Assumes H, W divisible by the network stride (4)."""
    B, _, H, W = images_nchw.shape
    x = jnp.transpose(images_nchw, (0, 2, 3, 1)).astype(jnp.bfloat16)  # NHWC

    # --- stem: Conv 3x3 s2 + BN + SiLU (lane-dense Pallas kernel) ---
    # TODO(synk): for real (640x640) inputs, assemble the 3x3 patches inside
    # the kernel per row band (halo rows) and fuse stem+conv2+head so the
    # im2col slabs and the a1 round trip never hit HBM (~4-5x less traffic).
    P1, H1, W1 = im2col(x, 3, 2, 1)
    a1 = stem_conv_silu(P1, pp["w1b"], pp["b1w"]).reshape(B, H1, W1, C1)

    # --- Conv 3x3 s2 + SiLU, Detect 1x1 head, box decode: one fused kernel ---
    P2, H2, W2 = im2col(a1, 3, 2, 1)
    stride = float(H) / float(H2)
    head_p, pred_p = conv_head_decode(
        P2, pp, ny=H2, nx=W2, stride=stride,
        want_pred=not training, want_head=training)

    if training:
        head = head_p[:, : NA * NO].reshape(B, H2, W2, NA, NO)
        train_pred = jnp.transpose(head, (0, 3, 1, 2, 4))     # [B,na,ny,nx,no]
        # TODO(synk): ComputeLoss (target assignment, CIoU/BCE) has no clean
        # fixed-shape Pallas equivalent; return the raw detect logits.
        return train_pred

    dec = pred_p[:, : NA * NO].reshape(B, H2, W2, NA, NO)
    pred = jnp.transpose(dec, (0, 3, 1, 2, 4)).reshape(B, NA * H2 * W2, NO)
    # TODO(synk): non_max_suppression + Instances/Boxes construction (dynamic
    # number of detections) stays outside; return the decoded predictions.
    return pred


# ----------------------------------------------------------------------------
# Pure-JAX reference (same prepared weights; validates the Pallas path)
# ----------------------------------------------------------------------------
def _silu(x):
    return x * jax.nn.sigmoid(x)


def yolov5_reference(images_nchw, pp):
    B, _, H, W = images_nchw.shape
    x = jnp.transpose(images_nchw, (0, 2, 3, 1)).astype(jnp.bfloat16)
    P1, H1, W1 = im2col(x, 3, 2, 1)
    w1 = pp["w1b"][:K1, :C1].astype(jnp.float32)              # block (0,0)
    b1 = pp["b1w"][:, :C1]
    a1 = _silu(P1.astype(jnp.float32) @ w1 + b1)
    a1 = a1.astype(jnp.bfloat16).reshape(B, H1, W1, C1)       # mirror kernel
    P2, H2, W2 = im2col(a1, 3, 2, 1)
    x2 = _silu(P2.astype(jnp.float32) @ pp["w2"].astype(jnp.float32) + pp["b2"])
    x2 = x2.astype(jnp.bfloat16).astype(jnp.float32)          # mirror kernel
    h = x2 @ pp["w3"].astype(jnp.float32)[:, : NA * NO] + pp["b3"][:, : NA * NO]
    head = h.reshape(B, H2, W2, NA, NO)
    y = jax.nn.sigmoid(head)
    gy, gx = jnp.meshgrid(jnp.arange(H2, dtype=jnp.float32),
                          jnp.arange(W2, dtype=jnp.float32), indexing="ij")
    grid = jnp.stack([gx, gy], -1)[None, :, :, None, :]
    stride = float(H) / float(H2)
    anchor = jnp.asarray(ANCHOR_GRID)[None, None, None, :, :]
    xy = (y[..., 0:2] * 2.0 - 0.5 + grid) * stride
    wh = (y[..., 2:4] * 2.0) ** 2 * anchor
    dec = jnp.concatenate([xy, wh, y[..., 4:]], -1)
    pred = jnp.transpose(dec, (0, 3, 1, 2, 4)).reshape(B, NA * H2 * W2, NO)
    train_pred = jnp.transpose(head, (0, 3, 1, 2, 4))
    return pred, train_pred


# ----------------------------------------------------------------------------
if __name__ == "__main__":
    key = jax.random.PRNGKey(0)
    pkey, ikey = jax.random.split(key)
    pp = prepare_params(init_params(pkey))

    # equivalent of [{'image': uint8 tensor [3,16,16]}, ...] stacked to NCHW
    B, H, W = 2, 16, 16
    images = jax.random.randint(
        ikey, (B, NUM_CHANNELS, H, W), 0, 256).astype(jnp.float32)

    infer_fn = jax.jit(functools.partial(yolov5_forward, training=False))
    train_fn = jax.jit(functools.partial(yolov5_forward, training=True))

    pred = infer_fn(images, pp)
    train_pred = train_fn(images, pp)
    jax.block_until_ready((pred, train_pred))

    H2 = H // 4
    assert pred.shape == (B, NA * H2 * H2, NO), pred.shape
    assert train_pred.shape == (B, NA, H2, H2, NO), train_pred.shape
    assert bool(jnp.isfinite(pred).all()) and bool(jnp.isfinite(train_pred).all())

    pred_ref, train_ref = yolov5_reference(images, pp)
    np.testing.assert_allclose(np.asarray(pred), np.asarray(pred_ref),
                               rtol=2e-2, atol=2e-2)
    np.testing.assert_allclose(np.asarray(train_pred), np.asarray(train_ref),
                               rtol=2e-2, atol=2e-2)
    print("KERNEL_OK")
</pallas_src>

<mosaic_0001>
module attributes {stable_mosaic.version = 11 : i64} {
  func.func @_conv_silu_kernel(%arg0: i32, %arg1: memref<8x432xbf16, #tpu.memory_space<vmem>>, %arg2: memref<432x128xbf16, #tpu.memory_space<vmem>>, %arg3: memref<1x128xf32, #tpu.memory_space<vmem>>, %arg4: memref<8x128xbf16, #tpu.memory_space<vmem>>) attributes {dimension_semantics = [#tpu.dimension_semantics<parallel>], iteration_bounds = array<i64: 1>, scalar_prefetch = 0 : i64, scratch_operands = 0 : i64, tpu.core_type = #tpu.core_type<tc>, window_params = [{transform_indices = @transform_0, window_bounds = array<i64: 8, 432>}, {pipeline_mode = #tpu.pipeline_mode<synchronous>, transform_indices = @transform_1, window_bounds = array<i64: 432, 128>}, {pipeline_mode = #tpu.pipeline_mode<synchronous>, transform_indices = @transform_2, window_bounds = array<i64: 1, 128>}, {transform_indices = @transform_3, window_bounds = array<i64: 8, 128>}]} {
    %c0 = arith.constant 0 : index
    %c0_0 = arith.constant 0 : index
    %0 = vector.load %arg1[%c0, %c0_0] : memref<8x432xbf16, #tpu.memory_space<vmem>>, vector<8x432xbf16>
    %c0_1 = arith.constant 0 : index
    %c0_2 = arith.constant 0 : index
    %1 = vector.load %arg2[%c0_1, %c0_2] : memref<432x128xbf16, #tpu.memory_space<vmem>>, vector<432x128xbf16>
    %cst = arith.constant dense<0.000000e+00> : vector<8x128xf32>
    %2 = tpu.matmul %0, %1, %cst {dimension_numbers = #tpu.dot_dimension_numbers<[1], [0], [0], [1], [0, 0, 1, 1], [], []>} : vector<8x432xbf16>, vector<432x128xbf16>, vector<8x128xf32> -> vector<8x128xf32>
    %c0_3 = arith.constant 0 : index
    %c0_4 = arith.constant 0 : index
    %3 = vector.load %arg3[%c0_3, %c0_4] : memref<1x128xf32, #tpu.memory_space<vmem>>, vector<1x128xf32>
    %4 = vector.broadcast %3 : vector<1x128xf32> to vector<8x128xf32>
    %5 = arith.addf %2, %4 : vector<8x128xf32>
    %6 = arith.negf %5 : vector<8x128xf32>
    %7 = math.exp %6 : vector<8x128xf32>
    %cst_5 = arith.constant 1.000000e+00 : f32
    %8 = vector.broadcast %cst_5 : f32 to vector<8x128xf32>
    %9 = arith.addf %8, %7 : vector<8x128xf32>
    %10 = arith.divf %8, %9 : vector<8x128xf32>
    %11 = arith.mulf %5, %10 : vector<8x128xf32>
    %12 = arith.truncf %11 : vector<8x128xf32> to vector<8x128xbf16>
    %c0_6 = arith.constant 0 : index
    %c0_7 = arith.constant 0 : index
    %13 = vector.load %arg4[%c0_6, %c0_7] : memref<8x128xbf16, #tpu.memory_space<vmem>>, vector<8x128xbf16>
    tpu.vector_store %arg4[%c0_6, %c0_7], %12 {strides = array<i32>} : memref<8x128xbf16, #tpu.memory_space<vmem>>, vector<8x128xbf16>,
    return
  }
  func.func @transform_0(%arg0: i32) -> (i32, i32) {
    %c0_i32 = arith.constant 0 : i32
    %c0_i32_0 = arith.constant 0 : i32
    return %arg0, %c0_i32 : i32, i32
  }
  func.func @transform_1(%arg0: i32) -> (i32, i32) {
    %c0_i32 = arith.constant 0 : i32
    %c0_i32_0 = arith.constant 0 : i32
    %c0_i32_1 = arith.constant 0 : i32
    return %c0_i32, %c0_i32_0 : i32, i32
  }
  func.func @transform_2(%arg0: i32) -> (i32, i32) {
    %c0_i32 = arith.constant 0 : i32
    %c0_i32_0 = arith.constant 0 : i32
    %c0_i32_1 = arith.constant 0 : i32
    return %c0_i32, %c0_i32_0 : i32, i32
  }
  func.func @transform_3(%arg0: i32) -> (i32, i32) {
    %c0_i32 = arith.constant 0 : i32
    %c0_i32_0 = arith.constant 0 : i32
    return %arg0, %c0_i32 : i32, i32
  }
}

module attributes {stable_mosaic.version = 11 : i64} {
  func.func @_conv_head_decode_kernel(%arg0: i32, %arg1: memref<16x72xbf16, #tpu.memory_space<vmem>>, %arg2: memref<72x16xbf16, #tpu.memory_space<vmem>>, %arg3: memref<1x16xf32, #tpu.memory_space<vmem>>, %arg4: memref<16x128xbf16, #tpu.memory_space<vmem>>, %arg5: memref<1x128xf32, #tpu.memory_space<vmem>>, %arg6: memref<8x128xf32, #tpu.memory_space<vmem>>, %arg7: memref<16x128xf32, #tpu.memory_space<vmem>>) attributes {dimension_semantics = [#tpu.dimension_semantics<parallel>], iteration_bounds = array<i64: 2>, scalar_prefetch = 0 : i64, scratch_operands = 0 : i64, tpu.core_type = #tpu.core_type<tc>, window_params = [{transform_indices = @transform_0, window_bounds = array<i64: 16, 72>}, {pipeline_mode = #tpu.pipeline_mode<synchronous>, transform_indices = @transform_1, window_bounds = array<i64: 72, 16>}, {pipeline_mode = #tpu.pipeline_mode<synchronous>, transform_indices = @transform_2, window_bounds = array<i64: 1, 16>}, {pipeline_mode = #tpu.pipeline_mode<synchronous>, transform_indices = @transform_3, window_bounds = array<i64: 16, 128>}, {pipeline_mode = #tpu.pipeline_mode<synchronous>, transform_indices = @transform_4, window_bounds = array<i64: 1, 128>}, {pipeline_mode = #tpu.pipeline_mode<synchronous>, transform_indices = @transform_5, window_bounds = array<i64: 8, 128>}, {transform_indices = @transform_6, window_bounds = array<i64: 16, 128>}]} {
    %c0 = arith.constant 0 : index
    %c0_0 = arith.constant 0 : index
    %0 = vector.load %arg1[%c0, %c0_0] : memref<16x72xbf16, #tpu.memory_space<vmem>>, vector<16x72xbf16>
    %c0_1 = arith.constant 0 : index
    %c0_2 = arith.constant 0 : index
    %1 = vector.load %arg2[%c0_1, %c0_2] : memref<72x16xbf16, #tpu.memory_space<vmem>>, vector<72x16xbf16>
    %cst = arith.constant dense<0.000000e+00> : vector<16x16xf32>
    %2 = tpu.matmul %0, %1, %cst {dimension_numbers = #tpu.dot_dimension_numbers<[1], [0], [0], [1], [0, 0, 1, 1], [], []>} : vector<16x72xbf16>, vector<72x16xbf16>, vector<16x16xf32> -> vector<16x16xf32>
    %c0_3 = arith.constant 0 : index
    %c0_4 = arith.constant 0 : index
    %3 = vector.load %arg3[%c0_3, %c0_4] : memref<1x16xf32, #tpu.memory_space<vmem>>, vector<1x16xf32>
    %4 = vector.broadcast %3 : vector<1x16xf32> to vector<16x16xf32>
    %5 = arith.addf %2, %4 : vector<16x16xf32>
    %6 = arith.negf %5 : vector<16x16xf32>
    %7 = math.exp %6 : vector<16x16xf32>
    %cst_5 = arith.constant 1.000000e+00 : f32
    %8 = vector.broadcast %cst_5 : f32 to vector<16x16xf32>
    %9 = arith.addf %8, %7 : vector<16x16xf32>
    %10 = arith.divf %8, %9 : vector<16x16xf32>
    %11 = arith.mulf %5, %10 : vector<16x16xf32>
    %12 = arith.truncf %11 : vector<16x16xf32> to vector<16x16xbf16>
    %c0_6 = arith.constant 0 : index
    %c0_7 = arith.constant 0 : index
    %13 = vector.load %arg4[%c0_6, %c0_7] : memref<16x128xbf16, #tpu.memory_space<vmem>>, vector<16x128xbf16>
    %cst_8 = arith.constant dense<0.000000e+00> : vector<16x128xf32>
    %14 = tpu.matmul %12, %13, %cst_8 {dimension_numbers = #tpu.dot_dimension_numbers<[1], [0], [0], [1], [0, 0, 1, 1], [], []>} : vector<16x16xbf16>, vector<16x128xbf16>, vector<16x128xf32> -> vector<16x128xf32>
    %c0_9 = arith.constant 0 : index
    %c0_10 = arith.constant 0 : index
    %15 = vector.load %arg5[%c0_9, %c0_10] : memref<1x128xf32, #tpu.memory_space<vmem>>, vector<1x128xf32>
    %16 = vector.broadcast %15 : vector<1x128xf32> to vector<16x128xf32>
    %17 = arith.addf %14, %16 : vector<16x128xf32>
    %c0_11 = arith.constant 0 : index
    %c0_12 = arith.constant 0 : index
    %18 = vector.load %arg6[%c0_11, %c0_12] : memref<8x128xf32, #tpu.memory_space<vmem>>, vector<8x128xf32>
    %19 = vector.extract_strided_slice %18 {offsets = [0, 0], sizes = [1, 128], strides = [1, 1]} : vector<8x128xf32> to vector<1x128xf32>
    %cst_13 = arith.constant 5.000000e-01 : f32
    %20 = vector.broadcast %cst_13 : f32 to vector<1x128xf32>
    %21 = arith.cmpf ogt, %19, %20 : vector<1x128xf32>
    %22 = vector.extract_strided_slice %18 {offsets = [1, 0], sizes = [1, 128], strides = [1, 1]} : vector<8x128xf32> to vector<1x128xf32>
    %cst_14 = arith.constant 5.000000e-01 : f32
    %23 = vector.broadcast %cst_14 : f32 to vector<1x128xf32>
    %24 = arith.cmpf ogt, %22, %23 : vector<1x128xf32>
    %25 = vector.extract_strided_slice %18 {offsets = [2, 0], sizes = [1, 128], strides = [1, 1]} : vector<8x128xf32> to vector<1x128xf32>
    %26 = vector.extract_strided_slice %18 {offsets = [3, 0], sizes = [1, 128], strides = [1, 1]} : vector<8x128xf32> to vector<1x128xf32>
    %27 = vector.extract_strided_slice %18 {offsets = [4, 0], sizes = [1, 128], strides = [1, 1]} : vector<8x128xf32> to vector<1x128xf32>
    %28 = arith.negf %17 : vector<16x128xf32>
    %29 = math.exp %28 : vector<16x128xf32>
    %cst_15 = arith.constant 1.000000e+00 : f32
    %30 = vector.broadcast %cst_15 : f32 to vector<16x128xf32>
    %31 = arith.addf %30, %29 : vector<16x128xf32>
    %32 = arith.divf %30, %31 : vector<16x128xf32>
    %c16_i32 = arith.constant 16 : i32
    %33 = arith.muli %arg0, %c16_i32 : i32
    %34 = tpu.iota {dimensions = array<i32: 0>} : vector<16x1xi32>
    %35 = vector.broadcast %33 : i32 to vector<16x1xi32>
    %36 = arith.addi %35, %34 : vector<16x1xi32>
    %37 = arith.sitofp %36 : vector<16x1xi32> to vector<16x1xf32>
    %cst_16 = arith.constant 5.000000e-01 : f32
    %38 = vector.broadcast %cst_16 : f32 to vector<16x1xf32>
    %39 = arith.addf %37, %38 : vector<16x1xf32>
    %cst_17 = arith.constant 2.500000e-01 : f32
    %40 = vector.broadcast %cst_17 : f32 to vector<16x1xf32>
    %41 = arith.mulf %39, %40 : vector<16x1xf32>
    %42 = math.floor %41 : vector<16x1xf32>
    %cst_18 = arith.constant 4.000000e+00 : f32
    %43 = vector.broadcast %cst_18 : f32 to vector<16x1xf32>
    %44 = arith.mulf %42, %43 : vector<16x1xf32>
    %45 = arith.subf %37, %44 : vector<16x1xf32>
    %cst_19 = arith.constant 5.000000e-01 : f32
    %46 = vector.broadcast %cst_19 : f32 to vector<16x1xf32>
    %47 = arith.addf %42, %46 : vector<16x1xf32>
    %cst_20 = arith.constant 2.500000e-01 : f32
    %48 = vector.broadcast %cst_20 : f32 to vector<16x1xf32>
    %49 = arith.mulf %47, %48 : vector<16x1xf32>
    %50 = math.floor %49 : vector<16x1xf32>
    %cst_21 = arith.constant 4.000000e+00 : f32
    %51 = vector.broadcast %cst_21 : f32 to vector<16x1xf32>
    %52 = arith.mulf %50, %51 : vector<16x1xf32>
    %53 = arith.subf %42, %52 : vector<16x1xf32>
    %54 = vector.broadcast %45 : vector<16x1xf32> to vector<16x128xf32>
    %55 = vector.broadcast %26 : vector<1x128xf32> to vector<16x128xf32>
    %56 = arith.mulf %54, %55 : vector<16x128xf32>
    %57 = vector.broadcast %53 : vector<16x1xf32> to vector<16x128xf32>
    %58 = vector.broadcast %27 : vector<1x128xf32> to vector<16x128xf32>
    %59 = arith.mulf %57, %58 : vector<16x128xf32>
    %60 = arith.addf %56, %59 : vector<16x128xf32>
    %cst_22 = arith.constant 2.000000e+00 : f32
    %61 = vector.broadcast %cst_22 : f32 to vector<16x128xf32>
    %62 = arith.mulf %32, %61 : vector<16x128xf32>
    %cst_23 = arith.constant 5.000000e-01 : f32
    %63 = vector.broadcast %cst_23 : f32 to vector<16x128xf32>
    %64 = arith.subf %62, %63 : vector<16x128xf32>
    %65 = arith.addf %64, %60 : vector<16x128xf32>
    %cst_24 = arith.constant 4.000000e+00 : f32
    %66 = vector.broadcast %cst_24 : f32 to vector<16x128xf32>
    %67 = arith.mulf %65, %66 : vector<16x128xf32>
    %cst_25 = arith.constant 2.000000e+00 : f32
    %68 = vector.broadcast %cst_25 : f32 to vector<16x128xf32>
    %69 = arith.mulf %32, %68 : vector<16x128xf32>
    %cst_26 = arith.constant 2.000000e+00 : f32
    %70 = vector.broadcast %cst_26 : f32 to vector<16x128xf32>
    %71 = arith.mulf %32, %70 : vector<16x128xf32>
    %72 = arith.mulf %69, %71 : vector<16x128xf32>
    %73 = vector.broadcast %25 : vector<1x128xf32> to vector<16x128xf32>
    %74 = arith.mulf %72, %73 : vector<16x128xf32>
    %75 = vector.shape_cast %24 : vector<1x128xi1> to vector<1x128xi1>
    %76 = vector.broadcast %75 : vector<1x128xi1> to vector<16x128xi1>
    %77 = arith.select %76, %74, %32 : vector<16x128xi1>, vector<16x128xf32>
    %78 = vector.shape_cast %21 : vector<1x128xi1> to vector<1x128xi1>
    %79 = vector.broadcast %78 : vector<1x128xi1> to vector<16x128xi1>
    %80 = arith.select %79, %67, %77 : vector<16x128xi1>, vector<16x128xf32>
    %c0_27 = arith.constant 0 : index
    %c0_28 = arith.constant 0 : index
    %81 = vector.load %arg7[%c0_27, %c0_28] : memref<16x128xf32, #tpu.memory_space<vmem>>, vector<16x128xf32>
    tpu.vector_store %arg7[%c0_27, %c0_28], %80 {strides = array<i32>} : memref<16x128xf32, #tpu.memory_space<vmem>>, vector<16x128xf32>,
    return
  }
  func.func @transform_0(%arg0: i32) -> (i32, i32) {
    %c0_i32 = arith.constant 0 : i32
    %c0_i32_0 = arith.constant 0 : i32
    return %arg0, %c0_i32 : i32, i32
  }
  func.func @transform_1(%arg0: i32) -> (i32, i32) {
    %c0_i32 = arith.constant 0 : i32
    %c0_i32_0 = arith.constant 0 : i32
    %c0_i32_1 = arith.constant 0 : i32
    return %c0_i32, %c0_i32_0 : i32, i32
  }
  func.func @transform_2(%arg0: i32) -> (i32, i32) {
    %c0_i32 = arith.constant 0 : i32
    %c0_i32_0 = arith.constant 0 : i32
    %c0_i32_1 = arith.constant 0 : i32
    return %c0_i32, %c0_i32_0 : i32, i32
  }
  func.func @transform_3(%arg0: i32) -> (i32, i32) {
    %c0_i32 = arith.constant 0 : i32
    %c0_i32_0 = arith.constant 0 : i32
    %c0_i32_1 = arith.constant 0 : i32
    return %c0_i32, %c0_i32_0 : i32, i32
  }
  func.func @transform_4(%arg0: i32) -> (i32, i32) {
    %c0_i32 = arith.constant 0 : i32
    %c0_i32_0 = arith.constant 0 : i32
    %c0_i32_1 = arith.constant 0 : i32
    return %c0_i32, %c0_i32_0 : i32, i32
  }
  func.func @transform_5(%arg0: i32) -> (i32, i32) {
    %c0_i32 = arith.constant 0 : i32
    %c0_i32_0 = arith.constant 0 : i32
    %c0_i32_1 = arith.constant 0 : i32
    return %c0_i32, %c0_i32_0 : i32, i32
  }
  func.func @transform_6(%arg0: i32) -> (i32, i32) {
    %c0_i32 = arith.constant 0 : i32
    %c0_i32_0 = arith.constant 0 : i32
    return %arg0, %c0_i32 : i32, i32
  }
}

</mosaic_0001>

<bundles_post_ra>
// kernel: yolov5_forward.2
= control target key start
LH: loop header
LB: loop body
LE: loop exit
PB: predicated region body
PF: predicated region fallthrough
CT: control target
= control target key end

     0   :  { %v442_v0 = vmov 0   ;;  %vm253_vm0 = vcmask 392192   ;;  %s567_s1 = inlined_call_operand.vmem [shape: bf16[432,128], index: 1, kind: input, shape index: {}]   ;;  %s568_s0 = inlined_call_operand.vmem [shape: bf16[8,432], index: 0, kind: input, shape index: {}]   ;;  %s569_s2 = inlined_call_operand.vmem [shape: f32[1,128], index: 2, kind: input, shape index: {}]   ;;  %s570_s3 = inlined_call_operand.vmem [shape: bf16[8,128], index: 3, kind: output, shape index: {}]  }
   0x1   :  { %297 = vmatprep.subr.bf16.mxu1 %v442_v0  ;;  %v407_v1 = vld [vmem:[%s567_s1 + $0x80] sm:$0xff]   ;;  %v410_v4 = vld [vmem:[%s567_s1 + $0x88] sm:$0xff]   ;;  %v413_v7 = vld [vmem:[%s567_s1 + $0x90] sm:$0xff]  }
   0x2   :  { %v408_v2 = vld [vmem:[%s567_s1 + $0x40] sm:$0xff]   ;;  %298 = vmatpush1.bf16.msra.mxu1 %v407_v1  ;;  %v411_v5 = vld [vmem:[%s567_s1 + $0x48] sm:$0xff]   ;;  %v414_v8 = vld [vmem:[%s567_s1 + $0x50] sm:$0xff]  }
   0x3   :  { %v409_v3 = vld [vmem:[%s567_s1] sm:$0xff]   ;;  %384 = vmatprep.subr.bf16.mxu0 %v408_v2  ;;  %299 = vmatprep.subr.bf16.mxu1 %v442_v0  ;;  %v412_v6 = vld [vmem:[%s567_s1 + $0x8] sm:$0xff]   ;;  %v415_v9 = vld [vmem:[%s567_s1 + $0x10] sm:$0xff]  }
   0x4   :  { %385 = vmatpush3.bf16.msra.mxu0 %v409_v3  ;;  %v416_v10 = vld [vmem:[%s567_s1 + $0x98] sm:$0xff]   ;;  %v420_v13 = vld [vmem:[%s567_s1 + $0x60] sm:$0xff]   ;;  %v423_v16 = vld [vmem:[%s567_s1 + $0x68] sm:$0xff]  }
   0x5   :  { %386 = vmatprep.subr.bf16.mxu0 %v411_v5  ;;  %v417_v11 = vld [vmem:[%s567_s1 + $0x58] sm:$0xff]   ;;  %v419_v14 = vld [vmem:[%s567_s1 + $0xa0] sm:$0xff]   ;;  %v422_v17 = vld [vmem:[%s567_s1 + $0xa8] sm:$0xff]  }
   0x6   :  { %300 = vmatpush1.bf16.msra.mxu1 %v410_v4  ;;  %v418_v12 = vld [vmem:[%s567_s1 + $0x18] sm:$0xff]   ;;  %v421_v15 = vld [vmem:[%s567_s1 + $0x20] sm:$0xff]   ;;  %v424_v18 = vld [vmem:[%s567_s1 + $0x28] sm:$0xff]  }
   0x7   :  { %301 = vmatprep.subr.bf16.mxu1 %v442_v0  ;;  %v426_v19 = vld [vmem:[%s567_s1 + $0x70] sm:$0xff]   ;;  %v429_v22 = vld [vmem:[%s567_s1 + $0x78] sm:$0xff]   ;;  %v15_v23 = vld [vmem:[%s568_s0] sm:$0xff] }
   0x8   :  { %387 = vmatpush3.bf16.msra.mxu0 %v412_v6  ;;  %v425_v20 = vld [vmem:[%s567_s1 + $0xb0] sm:$0xff]   ;;  %v428_v24 = vld [vmem:[%s567_s1 + $0xb8] sm:$0xff]   ;;  %v352_v25 = vcombine.high %v15_v23, %v15_v23  ;;  %v16_v26 = vld [vmem:[%s568_s0 + $0x8] sm:$0xff]  ;;  %v351_v30 = vcombine.low %v15_v23, %v15_v23 }
   0x9   :  { %388 = vmatprep.subr.bf16.mxu0 %v414_v8  ;;  %v427_v21 = vld [vmem:[%s567_s1 + $0x30] sm:$0xff]   ;;  %v430_v27 = vld [vmem:[%s567_s1 + $0x38] sm:$0xff]   ;;  %v354_v28 = vcombine.high %v16_v26, %v16_v26  ;;  %v431_v29 = vld [vmem:[%s567_s1 + $0xc0] sm:$0xff]   ;;  %v353_v33 = vcombine.low %v16_v26, %v16_v26 }
   0xa   :  { %302 = vmatpush1.bf16.msra.mxu1 %v413_v7  ;;  %289 = vmatprep.mubr.bf16.mxu0 %v352_v25  ;;  %v434_v31 = vld [vmem:[%s567_s1 + $0xc8] sm:$0xff]   ;;  %v435_v32 = vld [vmem:[%s567_s1 + $0xd0] sm:$0xff]   ;;  %v350_v39 = vld [vmem:[%s569_s2] ss:$0 sm:$0xff] }
   0xb   :  { %303 = vmatprep.subr.bf16.mxu1 %v442_v0  ;;  %382 = vmatprep.mubr.msk.bf16.mxu1 %vm253_vm0, %v354_v28 }
   0xc   :  { %389 = vmatpush3.bf16.msra.mxu0 %v415_v9 }
   0xd   :  { %390 = vmatprep.subr.bf16.mxu0 %v417_v11 }
   0xe   :  { %304 = vmatpush1.bf16.msra.mxu1 %v416_v10 }
   0xf   :  { %305 = vmatprep.subr.bf16.mxu1 %v442_v0 }
  0x10   :  { %391 = vmatpush3.bf16.msra.mxu0 %v418_v12 }
  0x11   :  { %392 = vmatprep.subr.bf16.mxu0 %v420_v13 }
  0x12   :  { %306 = vmatpush1.bf16.msra.mxu1 %v419_v14 }
  0x13   :  { %307 = vmatprep.subr.bf16.mxu1 %v442_v0 }
  0x14   :  { %393 = vmatpush3.bf16.msra.mxu0 %v421_v15 }
  0x15   :  { %394 = vmatprep.subr.bf16.mxu0 %v423_v16 }
  0x16   :  { %308 = vmatpush1.bf16.msra.mxu1 %v422_v17 }
  0x17   :  { %309 = vmatprep.subr.bf16.mxu1 %v442_v0 }
  0x18   :  { %395 = vmatpush3.bf16.msra.mxu0 %v424_v18 }
  0x19   :  { %396 = vmatprep.subr.bf16.mxu0 %v426_v19 }
  0x1a   :  { %310 = vmatpush1.bf16.msra.mxu1 %v425_v20 }
  0x1b   :  { %311 = vmatprep.subr.bf16.mxu1 %v442_v0 }
  0x1c   :  { %397 = vmatpush3.bf16.msra.mxu0 %v427_v21 }
  0x1d   :  { %398 = vmatprep.subr.bf16.mxu0 %v429_v22 }
  0x1e   :  { %312 = vmatpush1.bf16.msra.mxu1 %v428_v24 }
  0x1f   :  { %313 = vmatprep.subr.bf16.mxu1 %v442_v0 }
  0x20   :  { %399 = vmatpush3.bf16.msra.mxu0 %v430_v27 }
  0x22   :  { %314 = vmatpush1.bf16.msra.mxu1 %v431_v29 }
  0x23   :  { %290 = vmatmul.mubr.bf16.vlgmr.msra.gmra.mrb[0].mxu0 %v351_v30  ;;  %315 = vmatprep.subr.bf16.mxu1 %v442_v0 }
  0x26   :  { %316 = vmatpush1.bf16.msra.mxu1 %v434_v31 }
  0x27   :  { %317 = vmatprep.subr.bf16.mxu1 %v442_v0 }
  0x2a   :  { %318 = vmatpush1.bf16.msra.mxu1 %v435_v32 }
  0x2d   :  { %330 = vmatmul.mubr.bf16.vlgmr.msra.gmra.mrb[0].mxu1 %v353_v33 }
  0xf6   :  { %v400_v34 = vpop.f32.mrb[0].mxu0 }
  0xf7   :  { %v401_v35 = vpop.f32.mrb[1].mxu0 }
  0xf8   :  { %v402_v36 = vadd.f32 %v401_v35, %v400_v34  ;;  %v403_v37 = vpop.f32.mrb[2].mxu0 }
  0xf9   :  { %v404_v38 = vpop.f32.mrb[3].mxu0 }
  0xfa   :  { %v292_v40 = vadd.f32 %v402_v36, %v350_v39 }
 0x100   :  { %v331_v41 = vpop.f32.mrb[0].mxu1 }
 0x101   :  { %v332_v42 = vadd.f32 %v331_v41, %v292_v40  ;;  %v333_v43 = vpop.f32.mrb[1].mxu1 }
 0x102   :  { %v334_v44 = vpop.f32.mrb[2].mxu1 }
 0x103   :  { %v383_v45 = vmul.f32 -1.442695, %v332_v42  ;;  %v335_v46 = vpop.f32.mrb[3].mxu1 }
 0x105   :  { %438 = vpow2.f32 %v383_v45 }
 0x10f   :  { %v439_v47 = vpop.eup %438 }
 0x110   :  { %v340_v48 = vadd.f32 1.0, %v439_v47 }
 0x112   :  { %440 = vrcp.f32 %v340_v48 }
 0x11c   :  { %v441_v49 = vpop.eup %440 }
 0x11d   :  { %v343_v50 = vmul.f32 %v441_v49, %v332_v42 }
 0x11f   :  { %v344_v51 = vpack.c.bf16 %v343_v50, %v343_v50 }
 0x121   :  { %345 = vst [vmem:[%s570_s3] sm:$0xf] %v344_v51 }

// kernel: yolov5_forward.3
= control target key start
LH: loop header
LB: loop body
LE: loop exit
PB: predicated region body
PF: predicated region fallthrough
CT: control target
= control target key end

     0   :  { %s713_s21 = smov 0   ;;  %s774_s0 = inlined_call_operand.vmem [shape: bf16[32,72], index: 0, kind: input, shape index: {}]   ;;  %s775_s1 = inlined_call_operand.vmem [shape: bf16[72,16], index: 1, kind: input, shape index: {}]   ;;  %s776_s2 = inlined_call_operand.vmem [shape: f32[1,16], index: 2, kind: input, shape index: {}]   ;;  %s777_s3 = inlined_call_operand.vmem [shape: bf16[16,128], index: 3, kind: input, shape index: {}]   ;;  %s778_s4 = inlined_call_operand.vmem [shape: f32[1,128], index: 4, kind: input, shape index: {}]   ;;  %s779_s5 = inlined_call_operand.vmem [shape: f32[8,128], index: 5, kind: input, shape index: {}]   ;;  %s780_s6 = inlined_call_operand.vmem [shape: f32[32,128], index: 6, kind: output, shape index: {}]  }
   0x1 LB: > { %s576_s22 = sadd.s32 4294967295, %s673_s21   ;;  %p580_p0 = scmp.ge.s32.totalorder %s673_s21, 1  ;;  %s673_s21 = sphi %s713_s21, %s16_s21  }
   0x2   : > { %p213_p1 = scmp.lt.s32.totalorder %s673_s21, 3 }
   0x4   : > { %p214_p2 = pnand %p580_p0, %p213_p1 }
   0x5   : > { %v644_v0 = vld [vmem:[%s775_s1] sm:$0xff] (!%p214_p2)   ;;  %v675_v1 = vmov (!%p214_p2), 0.0   ;;  %v645_v2 = vld [vmem:[%s775_s1 + $0x8] sm:$0xff] (!%p214_p2)   ;;  %vm676_vm0 = vmmov (!%p214_p2), 0   ;;  %s581_s27 = sshll.u32 (!%p214_p2), %s576_s22, 1  ;;  %v646_v3 = vld [vmem:[%s775_s1 + $0x10] sm:$0xff] (!%p214_p2)   ;;  %v445_v27 = vlaneseq (!%p214_p2) }
   0x6   : > { %217 = sbr.rel (%p214_p2) target bundleno = 524 (0x20c), region = 44  ;;  %613 = vmatprep.subr.bf16.mxu0 (!%p214_p2), %v675_v1  ;;  %627 = vmatprep.subr.bf16.mxu1 (!%p214_p2), %v675_v1  ;;  %p244_p3 = scmp.lt.s32.totalorder (!%p214_p2), %s581_s27, 3  ;;  %v647_v4 = vld [vmem:[%s775_s1 + $0x18] sm:$0xff] (!%p214_p2)   ;;  %v648_v5 = vld [vmem:[%s775_s1 + $0x20] ss:$0 sps:$4 sm:$0xff] (!%p214_p2)   ;;  %vm310_vm1 = vcmask (!%p214_p2), 1043456  }
   0x7   : > { %614 = vmatpush3.bf16.msra.mxu0 (!%p214_p2), %v644_v0  ;;  %623 = vmatprep.mubr.msk.bf16.mxu0 (!%p214_p2), %vm676_vm0, %v675_v1  ;;  %v312_v6 = vsel (!%p214_p2), %vm310_vm1, %v648_v5, 0  ;;  %vm306_vm2 = vcmask (!%p214_p2), 588800   ;;  %v650_v8 = vld [vmem:[%s777_s3] sm:$0xff] (!%p214_p2)   ;;  %vm385_vm3 = vcmask (!%p214_p2), 130048   ;;  %s600_s18 = sshll.u32 (!%p214_p2), %s576_s22, 4  ;;  %v752_v28 = vshrl.u32 (!%p214_p2), %v445_v27, 7 }
   0x8   : > { %615 = vmatprep.subr.bf16.mxu0 (!%p214_p2), %v675_v1  ;;  %629 = vmatprep.mubr.msk.bf16.mxu1 (!%p214_p2), %vm676_vm0, %v675_v1  ;;  %v585_v9 = vld [vmem:[%s776_s2] ss:$0 sm:$0xff] (!%p214_p2)  ;;  %v448_v29 = vstv (!%p214_p2), %s600_s18 }
   0x9   : > { %628 = vmatpush3.bf16.msra.mxu1 (!%p214_p2), %v650_v8  ;;  %v447_v30 = vadd.s32 (!%p214_p2), 8, %v752_v28  ;;  %v449_v31 = vadd.s32 (!%p214_p2), %v448_v29, %v752_v28  ;;  %v595_v38 = vld [vmem:[%s778_s4] ss:$0 sm:$0xff] (!%p214_p2)  ;;  %v475_v61 = vsub.s32 (!%p214_p2), 3, %v752_v28  ;;  %v481_v62 = vsub.s32 (!%p214_p2), 4, %v752_v28 }
   0xa   : > { %v430_v63 = vld [vmem:[%s779_s5] sm:$0xff] (!%p214_p2) }
   0xb   : > { %616 = vmatpush3.bf16.msra.mxu0 (!%p214_p2), %v645_v2  ;;  %v450_v32 = vadd.s32 (!%p214_p2), %v448_v29, %v447_v30  ;;  %v451_v33 = vcvt.s32.f32 (!%p214_p2), %v449_v31  ;;  %v476_v5 = vrot.slane (!%p214_p2), %v430_v63, %v475_v61  ;;  %vm431_vm4 = vcmp.gt.f32.partialorder (!%p214_p2), %v430_v63, 0.5 }
   0xc   : > { %617 = vmatprep.subr.bf16.mxu0 (!%p214_p2), %v675_v1 }
   0xd   : > { %s782_s27 = smov (!%p244_p3, %s581_s27), 3  ;;  %v452_v34 = vcvt.s32.f32 %v450_v32  ;;  %v453_v35 = vadd.f32 0.5, %v451_v33 }
   0xe   : > { %s582_s30 = sshll.u32 %s782_s27, 2  ;;  %s584_s24 = sshll.u32 %s782_s27, 3 }
   0xf   : > { %s247_s9 = scalar_lea.vmem %s774_s0, %s582_s30  ;;  %618 = vmatpush3.bf16.msra.mxu0 %v646_v3  ;;  %v454_v36 = vadd.f32 0.5, %v452_v34  ;;  %v455_v37 = vmul.f32 0.25, %v453_v35  ;;  %s253_s28 = scalar_lea.vmem %s780_s6, %s584_s24 }
  0x10   : > { %619 = vmatprep.subr.bf16.mxu0 %v675_v1  ;;  %v649_v7 = vld [vmem:[%s247_s9] sm:$0xff]  }
  0x11   : > { %v456_v39 = vmul.f32 0.25, %v454_v36  ;;  %v457_v42 = vfloor.f32 %v455_v37 }
  0x13   : > { %620 = vmatpush3.bf16.msra.mxu0 %v647_v4  ;;  %v458_v47 = vfloor.f32 %v456_v39  ;;  %v463_v49 = vadd.f32 0.5, %v457_v42  ;;  %v459_v59 = vmul.f32 4.0, %v457_v42 }
  0x14   : > { %621 = vmatprep.subr.bf16.mxu0 %v675_v1 }
  0x15   : > { %v464_v51 = vadd.f32 0.5, %v458_v47  ;;  %v465_v52 = vmul.f32 0.25, %v463_v49  ;;  %v460_v1 = vmul.f32 4.0, %v458_v47  ;;  %v461_v3 = vsub.f32 %v451_v33, %v459_v59 }
  0x17   : > { %622 = vmatpush3.bf16.msra.mxu0 %v312_v6  ;;  %v466_v53 = vmul.f32 0.25, %v464_v51  ;;  %v467_v54 = vfloor.f32 %v465_v52  ;;  %v482_v6 = vrot.slane %v430_v63, %v481_v62 }
  0x19   : > { %v468_v56 = vfloor.f32 %v466_v53  ;;  %v469_v60 = vmul.f32 4.0, %v467_v54 }
  0x1a   : > { %624 = vmatmul.mubr.msk.bf16.vlgmr.msra.gmra.mrb[0].mxu0 %vm306_vm2, %v649_v7  ;;  %v462_v7 = vsub.f32 %v452_v34, %v460_v1 }
  0x1b   : > { %v470_v2 = vmul.f32 4.0, %v468_v56  ;;  %v471_v4 = vsub.f32 %v457_v42, %v469_v60 }
  0x1d   : > { %v472_v8 = vsub.f32 %v458_v47, %v470_v2 }
  0xed   : > { %v348_v10 = vpop.f32.mrb[0].mxu0 }
  0xee   : > { %v349_v11 = vadd.f32 %v585_v9, %v348_v10  ;;  %v625_v12 = vpop.f32.mrb[1].mxu0  ;;  %v477_v10 = vmul.f32 %v476_v5, %v461_v3 }
  0xef   : > { %v351_v13 = vpop.f32.mrb[2].mxu0  ;;  %v499_v12 = vsub.s32 2, %v752_v28 }
  0xf0   : > { %v593_v14 = vmul.f32 -1.442695, %v349_v11  ;;  %v352_v15 = vadd.f32 %v585_v9, %v351_v13  ;;  %v626_v16 = vpop.f32.mrb[3].mxu0  ;;  %v506_v9 = vsub.s32 1, %v752_v28  ;;  %v677_v13 = vmov 0  }
  0xf1   : > { %v478_v16 = vmul.f32 %v476_v5, %v462_v7 }
  0xf2   : > { %651 = vpow2.f32 %v593_v14  ;;  %v594_v17 = vmul.f32 -1.442695, %v352_v15  ;;  %v503_v14 = vsel %vm431_vm4, 1, %v677_v13 }
  0xf4   : > { %653 = vpow2.f32 %v594_v17  ;;  %v484_v17 = vmul.f32 %v482_v6, %v472_v8 }
  0xf6   : > { %v486_v27 = vadd.f32 %v484_v17, %v478_v16 }
  0xfc   : > { %v652_v18 = vpop.eup %651 }
  0xfd   : > { %v361_v19 = vadd.f32 1.0, %v652_v18 }
  0xfe   : > { %v654_v20 = vpop.eup %653 }
  0xff   : > { %655 = vrcp.f32 %v361_v19  ;;  %v362_v21 = vadd.f32 1.0, %v654_v20  ;;  %v507_v19 = vrot.slane %v503_v14, %v506_v9 }
 0x101   : > { %657 = vrcp.f32 %v362_v21  ;;  %vm508_vm5 = vcmp.eq.s32.totalorder %v507_v19, 1 }
 0x109   : > { %v656_v22 = vpop.eup %655 }
 0x10a   : > { %v367_v24 = vmul.f32 %v656_v22, %v349_v11  ;;  %v483_v11 = vmul.f32 %v482_v6, %v471_v4  ;;  %v500_v22 = vrot.slane %v430_v63, %v499_v12 }
 0x10b   : > { %v658_v23 = vpop.eup %657 }
 0x10c   : > { %v368_v25 = vmul.f32 %v658_v23, %v352_v15  ;;  %v513_v15 = vsub.s32 0, %v752_v28  ;;  %v485_v20 = vadd.f32 %v483_v11, %v477_v10 }
 0x10e   : > { %v369_v26 = vpack.c.bf16 %v368_v25, %v367_v24  ;;  %v514_v24 = vrot.slane %v503_v14, %v513_v15 }
 0x110   : > { %630 = vmatmul.mubr.msk.bf16.vlgmr.msra.gmra.mrb[0].mxu1 %vm385_vm3, %v369_v26  ;;  %vm515_vm6 = vcmp.eq.s32.totalorder %v514_v24, 1 }
 0x1e3   : > { %v423_v40 = vpop.f32.mrb[0].mxu1 }
 0x1e4   : > { %v424_v41 = vadd.f32 %v595_v38, %v423_v40  ;;  %v631_v43 = vpop.f32.mrb[1].mxu1 }
 0x1e5   : > { %v426_v44 = vpop.f32.mrb[2].mxu1 }
 0x1e6   : > { %v598_v45 = vmul.f32 -1.442695, %v424_v41  ;;  %v427_v46 = vadd.f32 %v595_v38, %v426_v44  ;;  %v632_v48 = vpop.f32.mrb[3].mxu1 }
 0x1e8   : > { %659 = vpow2.f32 %v598_v45  ;;  %v599_v50 = vmul.f32 -1.442695, %v427_v46 }
 0x1ea   : > { %661 = vpow2.f32 %v599_v50 }
 0x1f2   : > { %v660_v55 = vpop.eup %659 }
 0x1f3   : > { %v438_v57 = vadd.f32 1.0, %v660_v55 }
 0x1f4   : > { %v662_v58 = vpop.eup %661 }
 0x1f5   : > { %663 = vrcp.f32 %v438_v57  ;;  %v439_v0 = vadd.f32 1.0, %v662_v58 }
 0x1f7   : > { %665 = vrcp.f32 %v439_v0 }
 0x1ff   : > { %v664_v18 = vpop.eup %663 }
 0x200   : > { %v487_v21 = vmul.f32 2.0, %v664_v18 }
 0x201   : > { %v666_v23 = vpop.eup %665 }
 0x202   : > { %v601_v25 = vadd.f32 -0.5, %v487_v21  ;;  %v495_v26 = vmul.f32 %v487_v21, %v487_v21  ;;  %v488_v29 = vmul.f32 2.0, %v666_v23 }
 0x204   : > { %v491_v30 = vadd.f32 %v601_v25, %v485_v20  ;;  %v501_v31 = vmul.f32 %v500_v22, %v495_v26  ;;  %v602_v32 = vadd.f32 -0.5, %v488_v29  ;;  %v496_v33 = vmul.f32 %v488_v29, %v488_v29 }
 0x206   : > { %v493_v28 = vmul.f32 4.0, %v491_v30  ;;  %v509_v34 = vsel %vm508_vm5, %v501_v31, %v664_v18  ;;  %v492_v35 = vadd.f32 %v602_v32, %v486_v27  ;;  %v502_v36 = vmul.f32 %v500_v22, %v496_v33 }
 0x208   : > { %v516_v37 = vsel %vm515_vm6, %v493_v28, %v509_v34  ;;  %v494_v38 = vmul.f32 4.0, %v492_v35  ;;  %v510_v39 = vsel %vm508_vm5, %v502_v36, %v666_v23 }
 0x209   : > { %518 = vst [vmem:[%s253_s28] sm:$0xff] %v516_v37 }
 0x20a   : > { %v517_v40 = vsel %vm515_vm6, %v494_v38, %v510_v39 }
 0x20b   : > { %519 = vst [vmem:[%s253_s28 + $0x8] sm:$0xff] %v517_v40 }
 0x20c PF: > { %s16_s21 = sadd.s32 1, %s673_s21  }
 0x20d   : > { %p13_p4 = scmp.ge.s32.totalorder %s16_s21, 4  }
 0x20f   :  { %15 = sbr.rel (!%p13_p4) target bundleno = 1 (0x1), region = 74 }

</bundles_post_ra>
